<compile_context>
chip_gen: v7x
topology: tpu7x:2x2x1
jax: 0.10.0
libtpu: 0.0.40
codegen_flags: <defaults>
</compile_context>

<pallas_src>
import functools

import jax
import jax.numpy as jnp
import numpy as np
from jax.experimental import pallas as pl
from jax.experimental.pallas import tpu as pltpu


# ---------------------------------------------------------------------------
# Small helpers (plain JAX / host, one-time parameter folding & packing)
# ---------------------------------------------------------------------------
def _round_up(n, m):
    return (n + m - 1) // m * m


def _fold_bn(gamma, beta, running_mean, running_var, eps):
    """BatchNorm2d (inference mode) -> per-channel scale / bias."""
    scale = gamma / jnp.sqrt(running_var + eps)
    bias = beta - running_mean * scale
    return scale, bias


def _pack_weight(w, cin_pad, cout_pad, k_pad):
    """(Cout, Cin, 3, 3) torch layout -> (Cout_pad, K_pad) bf16, tap-major / cin-minor."""
    cout, cin, kh, kw = w.shape
    w = jnp.transpose(w, (0, 2, 3, 1))                              # (Cout, 3, 3, Cin)
    w = jnp.pad(w, ((0, cout_pad - cout), (0, 0), (0, 0), (0, cin_pad - cin)))
    w = w.reshape(cout_pad, kh * kw * cin_pad)
    w = jnp.pad(w, ((0, 0), (0, k_pad - w.shape[1])))               # zero K padding
    return w.astype(jnp.bfloat16)


def _pad_col(v, n_pad):
    v = v.astype(jnp.float32).reshape(-1)
    return jnp.pad(v, (0, n_pad - v.shape[0])).reshape(n_pad, 1)


def _tap_data(H, W):
    """Static per-tap flat offsets + edge masks for a 3x3 conv, padding=1, 'zeros'."""
    yy, xx = np.meshgrid(np.arange(H), np.arange(W), indexing="ij")
    offsets, needs_mask, masks = [], [], []
    for ky in range(3):
        for kx in range(3):
            dy, dx = ky - 1, kx - 1
            offsets.append(dy * W + dx)
            # A dy over/underflow reads the zero halo of the staging buffer and
            # is already exactly zero; only dx steps that wrap across a row
            # need an explicit mask.
            needs_mask.append(dx != 0)
            valid = ((yy + dy >= 0) & (yy + dy < H) &
                     (xx + dx >= 0) & (xx + dx < W))
            masks.append(valid.reshape(-1))
    masks = jnp.asarray(np.stack(masks)[:, None, :], dtype=jnp.bfloat16)   # (9, 1, HW)
    return tuple(offsets), tuple(needs_mask), masks


# ---------------------------------------------------------------------------
# Fused Pallas kernel: Conv3x3 + BN + ReLU, twice, intermediate kept in VMEM
# ---------------------------------------------------------------------------
def _double_conv_kernel(offsets, needs_mask,
                        x_ref, w1_ref, s1_ref, b1_ref,
                        w2_ref, s2_ref, b2_ref, m_ref,
                        o_ref,
                        fpad1_ref, fpad2_ref, p1_ref, p2_ref):
    # x_ref   : (1, Cin_p, HW)   one batch element; channels on sublanes,
    #                            flattened H*W (multiple of 128) on lanes.
    # w*_ref  : (C*_p, K_p)      bf16 conv weights, tap-major / channel-minor.
    # s*,b*   : (C*_p, 1)        folded BatchNorm scale / bias (f32).
    # m_ref   : (9, 1, HW)       bf16 column-edge validity masks per tap.
    # fpad*   : (C_p, 2*PAD+HW)  zero-halo staging buffers (bf16 scratch).
    # p*_ref  : (K_p, HW)        im2col patch matrices (bf16 scratch).
    # o_ref   : (1, Cout_p, HW)  f32 output (lane dense).
    hw = x_ref.shape[-1]
    pad = (fpad1_ref.shape[-1] - hw) // 2
    n_taps = len(offsets)

    # Hoist edge-mask loads: read each needed mask from VMEM once, reuse twice.
    mask_vals = {t: m_ref[t] for t in range(n_taps) if needs_mask[t]}

    def build_patch(feat, fpad_ref, patch_ref):
        c = fpad_ref.shape[0]
        # Stage the feature map between two zero halos so every 3x3 tap is a
        # plain static lane-offset slice of valid data.  Halos are (re)zeroed
        # every step so the kernel stays correct when the batch axis shards
        # across TensorCores (per-core scratch); the cost is negligible.
        fpad_ref[:, :pad] = jnp.zeros((c, pad), fpad_ref.dtype)
        fpad_ref[:, pad + hw:] = jnp.zeros((c, pad), fpad_ref.dtype)
        fpad_ref[:, pad:pad + hw] = feat
        for tap, off in enumerate(offsets):
            sl = fpad_ref[:, pad + off:pad + off + hw]
            if needs_mask[tap]:                       # zero row-wrapped edge reads
                sl = sl * mask_vals[tap]
            patch_ref[tap * c:(tap + 1) * c, :] = sl
        k_used = n_taps * c
        if patch_ref.shape[0] > k_used:               # exact zeros in the K padding
            patch_ref[k_used:, :] = jnp.zeros(
                (patch_ref.shape[0] - k_used, hw), patch_ref.dtype)

    # ---- conv1 + BN1 + ReLU : one MXU matmul, K = 9*Cin_p (padded to 128) ----
    build_patch(x_ref[0], fpad1_ref, p1_ref)
    y1 = jnp.dot(w1_ref[...], p1_ref[...], preferred_element_type=jnp.float32)
    y1 = jnp.maximum(y1 * s1_ref[...] + b1_ref[...], 0.0)          # (Cmid_p, HW) f32

    # ---- conv2 + BN2 + ReLU : intermediate never leaves VMEM ----
    build_patch(y1.astype(fpad2_ref.dtype), fpad2_ref, p2_ref)
    y2 = jnp.dot(w2_ref[...], p2_ref[...], preferred_element_type=jnp.float32)
    y2 = jnp.maximum(y2 * s2_ref[...] + b2_ref[...], 0.0)          # (Cout_p, HW) f32

    o_ref[0] = y2.astype(o_ref.dtype)


# ---------------------------------------------------------------------------
# Wrapper: parameter folding / packing + pallas_call
# ---------------------------------------------------------------------------
def double_convolution(x, params, eps=1e-5):
    """DoubleConvolution forward. x: (N, Cin, H, W) f32 NCHW (like PyTorch)."""
    N, Cin, H, W = x.shape
    HW = H * W
    Cmid = params["w1"].shape[0]
    Cout = params["w2"].shape[0]

    cin_p = _round_up(Cin, 16)           # bf16 sublane packing = 16 rows
    cmid_p = _round_up(Cmid, 16)
    cout_p = _round_up(Cout, 8)          # f32 output rows
    k1 = _round_up(9 * cin_p, 128)       # MXU-aligned contraction dims
    k2 = _round_up(9 * cmid_p, 128)
    pad = max(128, _round_up(W + 1, 128))  # zero-halo width of the staging buffers
    padw = 2 * pad + HW

    # ---- fold / pack parameters (one-time, plain JAX) ----
    s1, b1 = _fold_bn(params["gamma1"], params["beta1"],
                      params["mean1"], params["var1"], eps)
    s2, b2 = _fold_bn(params["gamma2"], params["beta2"],
                      params["mean2"], params["var2"], eps)
    w1m = _pack_weight(params["w1"], cin_p, cmid_p, k1)     # (Cmid_p, K1) bf16
    w2m = _pack_weight(params["w2"], cmid_p, cout_p, k2)    # (Cout_p, K2) bf16
    s1c, b1c = _pad_col(s1, cmid_p), _pad_col(b1, cmid_p)
    s2c, b2c = _pad_col(s2, cout_p), _pad_col(b2, cout_p)
    offsets, needs_mask, masks = _tap_data(H, W)

    # ---- activations: NCHW -> (N, Cin_p, H*W), channel pad = zeros, bf16 ----
    xf = x.reshape(N, Cin, HW)
    xf = jnp.pad(xf, ((0, 0), (0, cin_p - Cin), (0, 0))).astype(jnp.bfloat16)

    kernel = functools.partial(_double_conv_kernel, offsets, needs_mask)

    out = pl.pallas_call(
        kernel,
        out_shape=jax.ShapeDtypeStruct((N, cout_p, HW), jnp.float32),
        grid_spec=pltpu.PrefetchScalarGridSpec(
            num_scalar_prefetch=0,
            grid=(N,),     # batch across TensorCores on v7x; cheap serial steps on v5e/v6e
            in_specs=[
                pl.BlockSpec((1, cin_p, HW), lambda b: (b, 0, 0)),
                pl.BlockSpec((cmid_p, k1), lambda b: (0, 0)),
                pl.BlockSpec((cmid_p, 1), lambda b: (0, 0)),
                pl.BlockSpec((cmid_p, 1), lambda b: (0, 0)),
                pl.BlockSpec((cout_p, k2), lambda b: (0, 0)),
                pl.BlockSpec((cout_p, 1), lambda b: (0, 0)),
                pl.BlockSpec((cout_p, 1), lambda b: (0, 0)),
                pl.BlockSpec((9, 1, HW), lambda b: (0, 0, 0)),
            ],
            out_specs=pl.BlockSpec((1, cout_p, HW), lambda b: (b, 0, 0)),
            scratch_shapes=[
                pltpu.VMEM((cin_p, padw), jnp.bfloat16),    # halo buffer, conv1
                pltpu.VMEM((cmid_p, padw), jnp.bfloat16),   # halo buffer, conv2
                pltpu.VMEM((k1, HW), jnp.bfloat16),         # im2col patch, conv1
                pltpu.VMEM((k2, HW), jnp.bfloat16),         # im2col patch, conv2
            ],
        ),
        compiler_params=pltpu.CompilerParams(
            dimension_semantics=("parallel",)),
    )(xf, w1m, s1c, b1c, w2m, s2c, b2c, masks)

    return out[:, :Cout, :].reshape(N, Cout, H, W)


# ---------------------------------------------------------------------------
# Plain-JAX reference (for tolerance verification of the bf16 MXU path)
# ---------------------------------------------------------------------------
def _reference(x, params, eps=1e-5):
    def conv_bn_relu(h, w, gamma, beta, mean, var):
        y = jax.lax.conv_general_dilated(
            h, w, window_strides=(1, 1), padding=((1, 1), (1, 1)),
            dimension_numbers=("NCHW", "OIHW", "NCHW"),
            precision=jax.lax.Precision.HIGHEST)
        scale, bias = _fold_bn(gamma, beta, mean, var, eps)
        return jnp.maximum(
            y * scale[None, :, None, None] + bias[None, :, None, None], 0.0)

    h = conv_bn_relu(x, params["w1"], params["gamma1"], params["beta1"],
                     params["mean1"], params["var1"])
    return conv_bn_relu(h, params["w2"], params["gamma2"], params["beta2"],
                        params["mean2"], params["var2"])


# ---------------------------------------------------------------------------
# Deterministic parameter initialization (Conv bias=False + BatchNorm params)
# ---------------------------------------------------------------------------
def init_params(key, in_channels, out_channels, mid_channels=None):
    if not mid_channels:
        mid_channels = out_channels
    ks = jax.random.split(key, 6)

    def conv_w(k, cout, cin):
        return jax.random.normal(k, (cout, cin, 3, 3), jnp.float32) / jnp.sqrt(9.0 * cin)

    return dict(
        w1=conv_w(ks[0], mid_channels, in_channels),
        gamma1=1.0 + 0.1 * jax.random.normal(ks[1], (mid_channels,), jnp.float32),
        beta1=0.1 * jax.random.normal(ks[2], (mid_channels,), jnp.float32),
        mean1=jnp.zeros((mid_channels,), jnp.float32),
        var1=jnp.ones((mid_channels,), jnp.float32),
        w2=conv_w(ks[3], out_channels, mid_channels),
        gamma2=1.0 + 0.1 * jax.random.normal(ks[4], (out_channels,), jnp.float32),
        beta2=0.1 * jax.random.normal(ks[5], (out_channels,), jnp.float32),
        mean2=jnp.zeros((out_channels,), jnp.float32),
        var2=jnp.ones((out_channels,), jnp.float32),
    )


# ---------------------------------------------------------------------------
if __name__ == "__main__":
    N, Cin, H, W = 2, 4, 16, 16          # (Batch, in_channels, height, width)
    Cmid, Cout = 32, 32

    k_x, k_p = jax.random.split(jax.random.PRNGKey(0))
    x = jax.random.normal(k_x, (N, Cin, H, W), jnp.float32)
    params = init_params(k_p, Cin, Cout, Cmid)

    fwd = jax.jit(double_convolution)
    y = fwd(x, params)
    jax.block_until_ready(y)
    assert y.shape == (N, Cout, H, W), y.shape

    # Tolerance check vs XLA reference (kernel uses bf16 operands, f32 accumulate).
    y_ref = _reference(x, params)
    np.testing.assert_allclose(np.asarray(y), np.asarray(y_ref), rtol=5e-2, atol=5e-2)

    print("KERNEL_OK")
</pallas_src>

<mosaic_0001>
module attributes {stable_mosaic.version = 11 : i64} {
  func.func @_double_conv_kernel(%arg0: i32, %arg1: memref<1x16x256xbf16, #tpu.memory_space<vmem>>, %arg2: memref<32x256xbf16, #tpu.memory_space<vmem>>, %arg3: memref<32x1xf32, #tpu.memory_space<vmem>>, %arg4: memref<32x1xf32, #tpu.memory_space<vmem>>, %arg5: memref<32x384xbf16, #tpu.memory_space<vmem>>, %arg6: memref<32x1xf32, #tpu.memory_space<vmem>>, %arg7: memref<32x1xf32, #tpu.memory_space<vmem>>, %arg8: memref<9x1x256xbf16, #tpu.memory_space<vmem>>, %arg9: memref<1x32x256xf32, #tpu.memory_space<vmem>>, %arg10: memref<16x512xbf16, #tpu.memory_space<vmem>>, %arg11: memref<32x512xbf16, #tpu.memory_space<vmem>>, %arg12: memref<256x256xbf16, #tpu.memory_space<vmem>>, %arg13: memref<384x256xbf16, #tpu.memory_space<vmem>>) attributes {dimension_semantics = [#tpu.dimension_semantics<parallel>], iteration_bounds = array<i64: 2>, scalar_prefetch = 0 : i64, scratch_operands = 4 : i64, tpu.core_type = #tpu.core_type<tc>, window_params = [{transform_indices = @transform_0, window_bounds = array<i64: 1, 16, 256>}, {pipeline_mode = #tpu.pipeline_mode<synchronous>, transform_indices = @transform_1, window_bounds = array<i64: 32, 256>}, {pipeline_mode = #tpu.pipeline_mode<synchronous>, transform_indices = @transform_2, window_bounds = array<i64: 32, 1>}, {pipeline_mode = #tpu.pipeline_mode<synchronous>, transform_indices = @transform_3, window_bounds = array<i64: 32, 1>}, {pipeline_mode = #tpu.pipeline_mode<synchronous>, transform_indices = @transform_4, window_bounds = array<i64: 32, 384>}, {pipeline_mode = #tpu.pipeline_mode<synchronous>, transform_indices = @transform_5, window_bounds = array<i64: 32, 1>}, {pipeline_mode = #tpu.pipeline_mode<synchronous>, transform_indices = @transform_6, window_bounds = array<i64: 32, 1>}, {pipeline_mode = #tpu.pipeline_mode<synchronous>, transform_indices = @transform_7, window_bounds = array<i64: 9, 1, 256>}, {transform_indices = @transform_8, window_bounds = array<i64: 1, 32, 256>}]} {
    %c0 = arith.constant 0 : index
    %c0_0 = arith.constant 0 : index
    %c0_1 = arith.constant 0 : index
    %0 = vector.load %arg8[%c0, %c0_0, %c0_1] : memref<9x1x256xbf16, #tpu.memory_space<vmem>>, vector<1x1x256xbf16>
    %1 = vector.shape_cast %0 : vector<1x1x256xbf16> to vector<1x256xbf16>
    %c2 = arith.constant 2 : index
    %c0_2 = arith.constant 0 : index
    %c0_3 = arith.constant 0 : index
    %2 = vector.load %arg8[%c2, %c0_2, %c0_3] : memref<9x1x256xbf16, #tpu.memory_space<vmem>>, vector<1x1x256xbf16>
    %3 = vector.shape_cast %2 : vector<1x1x256xbf16> to vector<1x256xbf16>
    %c3 = arith.constant 3 : index
    %c0_4 = arith.constant 0 : index
    %c0_5 = arith.constant 0 : index
    %4 = vector.load %arg8[%c3, %c0_4, %c0_5] : memref<9x1x256xbf16, #tpu.memory_space<vmem>>, vector<1x1x256xbf16>
    %5 = vector.shape_cast %4 : vector<1x1x256xbf16> to vector<1x256xbf16>
    %c5 = arith.constant 5 : index
    %c0_6 = arith.constant 0 : index
    %c0_7 = arith.constant 0 : index
    %6 = vector.load %arg8[%c5, %c0_6, %c0_7] : memref<9x1x256xbf16, #tpu.memory_space<vmem>>, vector<1x1x256xbf16>
    %7 = vector.shape_cast %6 : vector<1x1x256xbf16> to vector<1x256xbf16>
    %c6 = arith.constant 6 : index
    %c0_8 = arith.constant 0 : index
    %c0_9 = arith.constant 0 : index
    %8 = vector.load %arg8[%c6, %c0_8, %c0_9] : memref<9x1x256xbf16, #tpu.memory_space<vmem>>, vector<1x1x256xbf16>
    %9 = vector.shape_cast %8 : vector<1x1x256xbf16> to vector<1x256xbf16>
    %c8 = arith.constant 8 : index
    %c0_10 = arith.constant 0 : index
    %c0_11 = arith.constant 0 : index
    %10 = vector.load %arg8[%c8, %c0_10, %c0_11] : memref<9x1x256xbf16, #tpu.memory_space<vmem>>, vector<1x1x256xbf16>
    %11 = vector.shape_cast %10 : vector<1x1x256xbf16> to vector<1x256xbf16>
    %c0_12 = arith.constant 0 : index
    %c0_13 = arith.constant 0 : index
    %c0_14 = arith.constant 0 : index
    %12 = vector.load %arg1[%c0_12, %c0_13, %c0_14] : memref<1x16x256xbf16, #tpu.memory_space<vmem>>, vector<1x16x256xbf16>
    %13 = vector.shape_cast %12 : vector<1x16x256xbf16> to vector<16x256xbf16>
    %cst = arith.constant 0.000000e+00 : bf16
    %14 = vector.broadcast %cst : bf16 to vector<16x128xbf16>
    %c0_15 = arith.constant 0 : index
    %c0_16 = arith.constant 0 : index
    %15 = vector.load %arg10[%c0_15, %c0_16] : memref<16x512xbf16, #tpu.memory_space<vmem>>, vector<16x128xbf16>
    tpu.vector_store %arg10[%c0_15, %c0_16], %14 {strides = array<i32>} : memref<16x512xbf16, #tpu.memory_space<vmem>>, vector<16x128xbf16>,
    %cst_17 = arith.constant 0.000000e+00 : bf16
    %16 = vector.broadcast %cst_17 : bf16 to vector<16x128xbf16>
    %c0_18 = arith.constant 0 : index
    %c384 = arith.constant 384 : index
    %17 = vector.load %arg10[%c0_18, %c384] : memref<16x512xbf16, #tpu.memory_space<vmem>>, vector<16x128xbf16>
    tpu.vector_store %arg10[%c0_18, %c384], %16 {strides = array<i32>} : memref<16x512xbf16, #tpu.memory_space<vmem>>, vector<16x128xbf16>,
    %c0_19 = arith.constant 0 : index
    %c128 = arith.constant 128 : index
    %18 = vector.load %arg10[%c0_19, %c128] : memref<16x512xbf16, #tpu.memory_space<vmem>>, vector<16x256xbf16>
    tpu.vector_store %arg10[%c0_19, %c128], %13 {strides = array<i32>} : memref<16x512xbf16, #tpu.memory_space<vmem>>, vector<16x256xbf16>,
    %c0_20 = arith.constant 0 : index
    %c111 = arith.constant 111 : index
    %19 = vector.load %arg10[%c0_20, %c111] : memref<16x512xbf16, #tpu.memory_space<vmem>>, vector<16x256xbf16>
    %20 = vector.broadcast %1 : vector<1x256xbf16> to vector<16x256xbf16>
    %21 = arith.mulf %19, %20 : vector<16x256xbf16>
    %c0_21 = arith.constant 0 : index
    %c0_22 = arith.constant 0 : index
    %22 = vector.load %arg12[%c0_21, %c0_22] : memref<256x256xbf16, #tpu.memory_space<vmem>>, vector<16x256xbf16>
    tpu.vector_store %arg12[%c0_21, %c0_22], %21 {strides = array<i32>} : memref<256x256xbf16, #tpu.memory_space<vmem>>, vector<16x256xbf16>,
    %c0_23 = arith.constant 0 : index
    %c112 = arith.constant 112 : index
    %23 = vector.load %arg10[%c0_23, %c112] : memref<16x512xbf16, #tpu.memory_space<vmem>>, vector<16x256xbf16>
    %c16 = arith.constant 16 : index
    %c0_24 = arith.constant 0 : index
    %24 = vector.load %arg12[%c16, %c0_24] : memref<256x256xbf16, #tpu.memory_space<vmem>>, vector<16x256xbf16>
    tpu.vector_store %arg12[%c16, %c0_24], %23 {strides = array<i32>} : memref<256x256xbf16, #tpu.memory_space<vmem>>, vector<16x256xbf16>,
    %c0_25 = arith.constant 0 : index
    %c113 = arith.constant 113 : index
    %25 = vector.load %arg10[%c0_25, %c113] : memref<16x512xbf16, #tpu.memory_space<vmem>>, vector<16x256xbf16>
    %26 = vector.broadcast %3 : vector<1x256xbf16> to vector<16x256xbf16>
    %27 = arith.mulf %25, %26 : vector<16x256xbf16>
    %c32 = arith.constant 32 : index
    %c0_26 = arith.constant 0 : index
    %28 = vector.load %arg12[%c32, %c0_26] : memref<256x256xbf16, #tpu.memory_space<vmem>>, vector<16x256xbf16>
    tpu.vector_store %arg12[%c32, %c0_26], %27 {strides = array<i32>} : memref<256x256xbf16, #tpu.memory_space<vmem>>, vector<16x256xbf16>,
    %c0_27 = arith.constant 0 : index
    %c127 = arith.constant 127 : index
    %29 = vector.load %arg10[%c0_27, %c127] : memref<16x512xbf16, #tpu.memory_space<vmem>>, vector<16x256xbf16>
    %30 = vector.broadcast %5 : vector<1x256xbf16> to vector<16x256xbf16>
    %31 = arith.mulf %29, %30 : vector<16x256xbf16>
    %c48 = arith.constant 48 : index
    %c0_28 = arith.constant 0 : index
    %32 = vector.load %arg12[%c48, %c0_28] : memref<256x256xbf16, #tpu.memory_space<vmem>>, vector<16x256xbf16>
    tpu.vector_store %arg12[%c48, %c0_28], %31 {strides = array<i32>} : memref<256x256xbf16, #tpu.memory_space<vmem>>, vector<16x256xbf16>,
    %c0_29 = arith.constant 0 : index
    %c128_30 = arith.constant 128 : index
    %33 = vector.load %arg10[%c0_29, %c128_30] : memref<16x512xbf16, #tpu.memory_space<vmem>>, vector<16x256xbf16>
    %c64 = arith.constant 64 : index
    %c0_31 = arith.constant 0 : index
    %34 = vector.load %arg12[%c64, %c0_31] : memref<256x256xbf16, #tpu.memory_space<vmem>>, vector<16x256xbf16>
    tpu.vector_store %arg12[%c64, %c0_31], %33 {strides = array<i32>} : memref<256x256xbf16, #tpu.memory_space<vmem>>, vector<16x256xbf16>,
    %c0_32 = arith.constant 0 : index
    %c129 = arith.constant 129 : index
    %35 = vector.load %arg10[%c0_32, %c129] : memref<16x512xbf16, #tpu.memory_space<vmem>>, vector<16x256xbf16>
    %36 = vector.broadcast %7 : vector<1x256xbf16> to vector<16x256xbf16>
    %37 = arith.mulf %35, %36 : vector<16x256xbf16>
    %c80 = arith.constant 80 : index
    %c0_33 = arith.constant 0 : index
    %38 = vector.load %arg12[%c80, %c0_33] : memref<256x256xbf16, #tpu.memory_space<vmem>>, vector<16x256xbf16>
    tpu.vector_store %arg12[%c80, %c0_33], %37 {strides = array<i32>} : memref<256x256xbf16, #tpu.memory_space<vmem>>, vector<16x256xbf16>,
    %c0_34 = arith.constant 0 : index
    %c143 = arith.constant 143 : index
    %39 = vector.load %arg10[%c0_34, %c143] : memref<16x512xbf16, #tpu.memory_space<vmem>>, vector<16x256xbf16>
    %40 = vector.broadcast %9 : vector<1x256xbf16> to vector<16x256xbf16>
    %41 = arith.mulf %39, %40 : vector<16x256xbf16>
    %c96 = arith.constant 96 : index
    %c0_35 = arith.constant 0 : index
    %42 = vector.load %arg12[%c96, %c0_35] : memref<256x256xbf16, #tpu.memory_space<vmem>>, vector<16x256xbf16>
    tpu.vector_store %arg12[%c96, %c0_35], %41 {strides = array<i32>} : memref<256x256xbf16, #tpu.memory_space<vmem>>, vector<16x256xbf16>,
    %c0_36 = arith.constant 0 : index
    %c144 = arith.constant 144 : index
    %43 = vector.load %arg10[%c0_36, %c144] : memref<16x512xbf16, #tpu.memory_space<vmem>>, vector<16x256xbf16>
    %c112_37 = arith.constant 112 : index
    %c0_38 = arith.constant 0 : index
    %44 = vector.load %arg12[%c112_37, %c0_38] : memref<256x256xbf16, #tpu.memory_space<vmem>>, vector<16x256xbf16>
    tpu.vector_store %arg12[%c112_37, %c0_38], %43 {strides = array<i32>} : memref<256x256xbf16, #tpu.memory_space<vmem>>, vector<16x256xbf16>,
    %c0_39 = arith.constant 0 : index
    %c145 = arith.constant 145 : index
    %45 = vector.load %arg10[%c0_39, %c145] : memref<16x512xbf16, #tpu.memory_space<vmem>>, vector<16x256xbf16>
    %46 = vector.broadcast %11 : vector<1x256xbf16> to vector<16x256xbf16>
    %47 = arith.mulf %45, %46 : vector<16x256xbf16>
    %c128_40 = arith.constant 128 : index
    %c0_41 = arith.constant 0 : index
    %48 = vector.load %arg12[%c128_40, %c0_41] : memref<256x256xbf16, #tpu.memory_space<vmem>>, vector<16x256xbf16>
    tpu.vector_store %arg12[%c128_40, %c0_41], %47 {strides = array<i32>} : memref<256x256xbf16, #tpu.memory_space<vmem>>, vector<16x256xbf16>,
    %cst_42 = arith.constant 0.000000e+00 : bf16
    %49 = vector.broadcast %cst_42 : bf16 to vector<112x256xbf16>
    %c144_43 = arith.constant 144 : index
    %c0_44 = arith.constant 0 : index
    %50 = vector.load %arg12[%c144_43, %c0_44] : memref<256x256xbf16, #tpu.memory_space<vmem>>, vector<112x256xbf16>
    tpu.vector_store %arg12[%c144_43, %c0_44], %49 {strides = array<i32>} : memref<256x256xbf16, #tpu.memory_space<vmem>>, vector<112x256xbf16>,
    %c0_45 = arith.constant 0 : index
    %c0_46 = arith.constant 0 : index
    %51 = vector.load %arg2[%c0_45, %c0_46] : memref<32x256xbf16, #tpu.memory_space<vmem>>, vector<32x256xbf16>
    %c0_47 = arith.constant 0 : index
    %c0_48 = arith.constant 0 : index
    %52 = vector.load %arg12[%c0_47, %c0_48] : memref<256x256xbf16, #tpu.memory_space<vmem>>, vector<256x256xbf16>
    %cst_49 = arith.constant dense<0.000000e+00> : vector<32x256xf32>
    %53 = tpu.matmul %51, %52, %cst_49 {dimension_numbers = #tpu.dot_dimension_numbers<[1], [0], [0], [1], [0, 0, 1, 1], [], []>} : vector<32x256xbf16>, vector<256x256xbf16>, vector<32x256xf32> -> vector<32x256xf32>
    %c0_50 = arith.constant 0 : index
    %c0_51 = arith.constant 0 : index
    %54 = vector.load %arg3[%c0_50, %c0_51] : memref<32x1xf32, #tpu.memory_space<vmem>>, vector<32x1xf32>
    %55 = vector.broadcast %54 : vector<32x1xf32> to vector<32x256xf32>
    %56 = arith.mulf %53, %55 : vector<32x256xf32>
    %c0_52 = arith.constant 0 : index
    %c0_53 = arith.constant 0 : index
    %57 = vector.load %arg4[%c0_52, %c0_53] : memref<32x1xf32, #tpu.memory_space<vmem>>, vector<32x1xf32>
    %58 = vector.broadcast %57 : vector<32x1xf32> to vector<32x256xf32>
    %59 = arith.addf %56, %58 : vector<32x256xf32>
    %cst_54 = arith.constant 0.000000e+00 : f32
    %60 = vector.broadcast %cst_54 : f32 to vector<32x256xf32>
    %61 = arith.maximumf %59, %60 : vector<32x256xf32>
    %62 = arith.truncf %61 : vector<32x256xf32> to vector<32x256xbf16>
    %cst_55 = arith.constant 0.000000e+00 : bf16
    %63 = vector.broadcast %cst_55 : bf16 to vector<32x128xbf16>
    %c0_56 = arith.constant 0 : index
    %c0_57 = arith.constant 0 : index
    %64 = vector.load %arg11[%c0_56, %c0_57] : memref<32x512xbf16, #tpu.memory_space<vmem>>, vector<32x128xbf16>
    tpu.vector_store %arg11[%c0_56, %c0_57], %63 {strides = array<i32>} : memref<32x512xbf16, #tpu.memory_space<vmem>>, vector<32x128xbf16>,
    %cst_58 = arith.constant 0.000000e+00 : bf16
    %65 = vector.broadcast %cst_58 : bf16 to vector<32x128xbf16>
    %c0_59 = arith.constant 0 : index
    %c384_60 = arith.constant 384 : index
    %66 = vector.load %arg11[%c0_59, %c384_60] : memref<32x512xbf16, #tpu.memory_space<vmem>>, vector<32x128xbf16>
    tpu.vector_store %arg11[%c0_59, %c384_60], %65 {strides = array<i32>} : memref<32x512xbf16, #tpu.memory_space<vmem>>, vector<32x128xbf16>,
    %c0_61 = arith.constant 0 : index
    %c128_62 = arith.constant 128 : index
    %67 = vector.load %arg11[%c0_61, %c128_62] : memref<32x512xbf16, #tpu.memory_space<vmem>>, vector<32x256xbf16>
    tpu.vector_store %arg11[%c0_61, %c128_62], %62 {strides = array<i32>} : memref<32x512xbf16, #tpu.memory_space<vmem>>, vector<32x256xbf16>,
    %c0_63 = arith.constant 0 : index
    %c111_64 = arith.constant 111 : index
    %68 = vector.load %arg11[%c0_63, %c111_64] : memref<32x512xbf16, #tpu.memory_space<vmem>>, vector<32x256xbf16>
    %69 = vector.broadcast %1 : vector<1x256xbf16> to vector<32x256xbf16>
    %70 = arith.mulf %68, %69 : vector<32x256xbf16>
    %c0_65 = arith.constant 0 : index
    %c0_66 = arith.constant 0 : index
    %71 = vector.load %arg13[%c0_65, %c0_66] : memref<384x256xbf16, #tpu.memory_space<vmem>>, vector<32x256xbf16>
    tpu.vector_store %arg13[%c0_65, %c0_66], %70 {strides = array<i32>} : memref<384x256xbf16, #tpu.memory_space<vmem>>, vector<32x256xbf16>,
    %c0_67 = arith.constant 0 : index
    %c112_68 = arith.constant 112 : index
    %72 = vector.load %arg11[%c0_67, %c112_68] : memref<32x512xbf16, #tpu.memory_space<vmem>>, vector<32x256xbf16>
    %c32_69 = arith.constant 32 : index
    %c0_70 = arith.constant 0 : index
    %73 = vector.load %arg13[%c32_69, %c0_70] : memref<384x256xbf16, #tpu.memory_space<vmem>>, vector<32x256xbf16>
    tpu.vector_store %arg13[%c32_69, %c0_70], %72 {strides = array<i32>} : memref<384x256xbf16, #tpu.memory_space<vmem>>, vector<32x256xbf16>,
    %c0_71 = arith.constant 0 : index
    %c113_72 = arith.constant 113 : index
    %74 = vector.load %arg11[%c0_71, %c113_72] : memref<32x512xbf16, #tpu.memory_space<vmem>>, vector<32x256xbf16>
    %75 = vector.broadcast %3 : vector<1x256xbf16> to vector<32x256xbf16>
    %76 = arith.mulf %74, %75 : vector<32x256xbf16>
    %c64_73 = arith.constant 64 : index
    %c0_74 = arith.constant 0 : index
    %77 = vector.load %arg13[%c64_73, %c0_74] : memref<384x256xbf16, #tpu.memory_space<vmem>>, vector<32x256xbf16>
    tpu.vector_store %arg13[%c64_73, %c0_74], %76 {strides = array<i32>} : memref<384x256xbf16, #tpu.memory_space<vmem>>, vector<32x256xbf16>,
    %c0_75 = arith.constant 0 : index
    %c127_76 = arith.constant 127 : index
    %78 = vector.load %arg11[%c0_75, %c127_76] : memref<32x512xbf16, #tpu.memory_space<vmem>>, vector<32x256xbf16>
    %79 = vector.broadcast %5 : vector<1x256xbf16> to vector<32x256xbf16>
    %80 = arith.mulf %78, %79 : vector<32x256xbf16>
    %c96_77 = arith.constant 96 : index
    %c0_78 = arith.constant 0 : index
    %81 = vector.load %arg13[%c96_77, %c0_78] : memref<384x256xbf16, #tpu.memory_space<vmem>>, vector<32x256xbf16>
    tpu.vector_store %arg13[%c96_77, %c0_78], %80 {strides = array<i32>} : memref<384x256xbf16, #tpu.memory_space<vmem>>, vector<32x256xbf16>,
    %c0_79 = arith.constant 0 : index
    %c128_80 = arith.constant 128 : index
    %82 = vector.load %arg11[%c0_79, %c128_80] : memref<32x512xbf16, #tpu.memory_space<vmem>>, vector<32x256xbf16>
    %c128_81 = arith.constant 128 : index
    %c0_82 = arith.constant 0 : index
    %83 = vector.load %arg13[%c128_81, %c0_82] : memref<384x256xbf16, #tpu.memory_space<vmem>>, vector<32x256xbf16>
    tpu.vector_store %arg13[%c128_81, %c0_82], %82 {strides = array<i32>} : memref<384x256xbf16, #tpu.memory_space<vmem>>, vector<32x256xbf16>,
    %c0_83 = arith.constant 0 : index
    %c129_84 = arith.constant 129 : index
    %84 = vector.load %arg11[%c0_83, %c129_84] : memref<32x512xbf16, #tpu.memory_space<vmem>>, vector<32x256xbf16>
    %85 = vector.broadcast %7 : vector<1x256xbf16> to vector<32x256xbf16>
    %86 = arith.mulf %84, %85 : vector<32x256xbf16>
    %c160 = arith.constant 160 : index
    %c0_85 = arith.constant 0 : index
    %87 = vector.load %arg13[%c160, %c0_85] : memref<384x256xbf16, #tpu.memory_space<vmem>>, vector<32x256xbf16>
    tpu.vector_store %arg13[%c160, %c0_85], %86 {strides = array<i32>} : memref<384x256xbf16, #tpu.memory_space<vmem>>, vector<32x256xbf16>,
    %c0_86 = arith.constant 0 : index
    %c143_87 = arith.constant 143 : index
    %88 = vector.load %arg11[%c0_86, %c143_87] : memref<32x512xbf16, #tpu.memory_space<vmem>>, vector<32x256xbf16>
    %89 = vector.broadcast %9 : vector<1x256xbf16> to vector<32x256xbf16>
    %90 = arith.mulf %88, %89 : vector<32x256xbf16>
    %c192 = arith.constant 192 : index
    %c0_88 = arith.constant 0 : index
    %91 = vector.load %arg13[%c192, %c0_88] : memref<384x256xbf16, #tpu.memory_space<vmem>>, vector<32x256xbf16>
    tpu.vector_store %arg13[%c192, %c0_88], %90 {strides = array<i32>} : memref<384x256xbf16, #tpu.memory_space<vmem>>, vector<32x256xbf16>,
    %c0_89 = arith.constant 0 : index
    %c144_90 = arith.constant 144 : index
    %92 = vector.load %arg11[%c0_89, %c144_90] : memref<32x512xbf16, #tpu.memory_space<vmem>>, vector<32x256xbf16>
    %c224 = arith.constant 224 : index
    %c0_91 = arith.constant 0 : index
    %93 = vector.load %arg13[%c224, %c0_91] : memref<384x256xbf16, #tpu.memory_space<vmem>>, vector<32x256xbf16>
    tpu.vector_store %arg13[%c224, %c0_91], %92 {strides = array<i32>} : memref<384x256xbf16, #tpu.memory_space<vmem>>, vector<32x256xbf16>,
    %c0_92 = arith.constant 0 : index
    %c145_93 = arith.constant 145 : index
    %94 = vector.load %arg11[%c0_92, %c145_93] : memref<32x512xbf16, #tpu.memory_space<vmem>>, vector<32x256xbf16>
    %95 = vector.broadcast %11 : vector<1x256xbf16> to vector<32x256xbf16>
    %96 = arith.mulf %94, %95 : vector<32x256xbf16>
    %c256 = arith.constant 256 : index
    %c0_94 = arith.constant 0 : index
    %97 = vector.load %arg13[%c256, %c0_94] : memref<384x256xbf16, #tpu.memory_space<vmem>>, vector<32x256xbf16>
    tpu.vector_store %arg13[%c256, %c0_94], %96 {strides = array<i32>} : memref<384x256xbf16, #tpu.memory_space<vmem>>, vector<32x256xbf16>,
    %cst_95 = arith.constant 0.000000e+00 : bf16
    %98 = vector.broadcast %cst_95 : bf16 to vector<96x256xbf16>
    %c288 = arith.constant 288 : index
    %c0_96 = arith.constant 0 : index
    %99 = vector.load %arg13[%c288, %c0_96] : memref<384x256xbf16, #tpu.memory_space<vmem>>, vector<96x256xbf16>
    tpu.vector_store %arg13[%c288, %c0_96], %98 {strides = array<i32>} : memref<384x256xbf16, #tpu.memory_space<vmem>>, vector<96x256xbf16>,
    %c0_97 = arith.constant 0 : index
    %c0_98 = arith.constant 0 : index
    %100 = vector.load %arg5[%c0_97, %c0_98] : memref<32x384xbf16, #tpu.memory_space<vmem>>, vector<32x384xbf16>
    %c0_99 = arith.constant 0 : index
    %c0_100 = arith.constant 0 : index
    %101 = vector.load %arg13[%c0_99, %c0_100] : memref<384x256xbf16, #tpu.memory_space<vmem>>, vector<384x256xbf16>
    %cst_101 = arith.constant dense<0.000000e+00> : vector<32x256xf32>
    %102 = tpu.matmul %100, %101, %cst_101 {dimension_numbers = #tpu.dot_dimension_numbers<[1], [0], [0], [1], [0, 0, 1, 1], [], []>} : vector<32x384xbf16>, vector<384x256xbf16>, vector<32x256xf32> -> vector<32x256xf32>
    %c0_102 = arith.constant 0 : index
    %c0_103 = arith.constant 0 : index
    %103 = vector.load %arg6[%c0_102, %c0_103] : memref<32x1xf32, #tpu.memory_space<vmem>>, vector<32x1xf32>
    %104 = vector.broadcast %103 : vector<32x1xf32> to vector<32x256xf32>
    %105 = arith.mulf %102, %104 : vector<32x256xf32>
    %c0_104 = arith.constant 0 : index
    %c0_105 = arith.constant 0 : index
    %106 = vector.load %arg7[%c0_104, %c0_105] : memref<32x1xf32, #tpu.memory_space<vmem>>, vector<32x1xf32>
    %107 = vector.broadcast %106 : vector<32x1xf32> to vector<32x256xf32>
    %108 = arith.addf %105, %107 : vector<32x256xf32>
    %cst_106 = arith.constant 0.000000e+00 : f32
    %109 = vector.broadcast %cst_106 : f32 to vector<32x256xf32>
    %110 = arith.maximumf %108, %109 : vector<32x256xf32>
    %c0_107 = arith.constant 0 : index
    %c0_108 = arith.constant 0 : index
    %c0_109 = arith.constant 0 : index
    %111 = vector.load %arg9[%c0_107, %c0_108, %c0_109] : memref<1x32x256xf32, #tpu.memory_space<vmem>>, vector<1x32x256xf32>
    %112 = vector.shape_cast %111 : vector<1x32x256xf32> to vector<32x256xf32>
    %113 = vector.shape_cast %110 : vector<32x256xf32> to vector<1x32x256xf32>
    tpu.vector_store %arg9[%c0_107, %c0_108, %c0_109], %113 {strides = array<i32>} : memref<1x32x256xf32, #tpu.memory_space<vmem>>, vector<1x32x256xf32>,
    return
  }
  func.func @transform_0(%arg0: i32) -> (i32, i32, i32) {
    %c0_i32 = arith.constant 0 : i32
    %c0_i32_0 = arith.constant 0 : i32
    %c0_i32_1 = arith.constant 0 : i32
    return %arg0, %c0_i32, %c0_i32_0 : i32, i32, i32
  }
  func.func @transform_1(%arg0: i32) -> (i32, i32) {
    %c0_i32 = arith.constant 0 : i32
    %c0_i32_0 = arith.constant 0 : i32
    %c0_i32_1 = arith.constant 0 : i32
    return %c0_i32, %c0_i32_0 : i32, i32
  }
  func.func @transform_2(%arg0: i32) -> (i32, i32) {
    %c0_i32 = arith.constant 0 : i32
    %c0_i32_0 = arith.constant 0 : i32
    %c0_i32_1 = arith.constant 0 : i32
    return %c0_i32, %c0_i32_0 : i32, i32
  }
  func.func @transform_3(%arg0: i32) -> (i32, i32) {
    %c0_i32 = arith.constant 0 : i32
    %c0_i32_0 = arith.constant 0 : i32
    %c0_i32_1 = arith.constant 0 : i32
    return %c0_i32, %c0_i32_0 : i32, i32
  }
  func.func @transform_4(%arg0: i32) -> (i32, i32) {
    %c0_i32 = arith.constant 0 : i32
    %c0_i32_0 = arith.constant 0 : i32
    %c0_i32_1 = arith.constant 0 : i32
    return %c0_i32, %c0_i32_0 : i32, i32
  }
  func.func @transform_5(%arg0: i32) -> (i32, i32) {
    %c0_i32 = arith.constant 0 : i32
    %c0_i32_0 = arith.constant 0 : i32
    %c0_i32_1 = arith.constant 0 : i32
    return %c0_i32, %c0_i32_0 : i32, i32
  }
  func.func @transform_6(%arg0: i32) -> (i32, i32) {
    %c0_i32 = arith.constant 0 : i32
    %c0_i32_0 = arith.constant 0 : i32
    %c0_i32_1 = arith.constant 0 : i32
    return %c0_i32, %c0_i32_0 : i32, i32
  }
  func.func @transform_7(%arg0: i32) -> (i32, i32, i32) {
    %c0_i32 = arith.constant 0 : i32
    %c0_i32_0 = arith.constant 0 : i32
    %c0_i32_1 = arith.constant 0 : i32
    %c0_i32_2 = arith.constant 0 : i32
    return %c0_i32, %c0_i32_0, %c0_i32_1 : i32, i32, i32
  }
  func.func @transform_8(%arg0: i32) -> (i32, i32, i32) {
    %c0_i32 = arith.constant 0 : i32
    %c0_i32_0 = arith.constant 0 : i32
    %c0_i32_1 = arith.constant 0 : i32
    return %arg0, %c0_i32, %c0_i32_0 : i32, i32, i32
  }
}

</mosaic_0001>

<bundles_post_ra>
// kernel: double_convolution.1
= control target key start
LH: loop header
LB: loop body
LE: loop exit
PB: predicated region body
PF: predicated region fallthrough
CT: control target
= control target key end

     0   :  { %s1824_s27 = smov 0   ;;  %s2261_s0 = inlined_call_operand.vmem [shape: bf16[2,16,256], index: 0, kind: input, shape index: {}]   ;;  %s2262_s1 = inlined_call_operand.vmem [shape: bf16[32,256], index: 1, kind: input, shape index: {}]   ;;  %s2263_s2 = inlined_call_operand.vmem [shape: f32[32,1], index: 2, kind: input, shape index: {}]   ;;  %s2264_s3 = inlined_call_operand.vmem [shape: f32[32,1], index: 3, kind: input, shape index: {}]   ;;  %s2265_s4 = inlined_call_operand.vmem [shape: bf16[32,384], index: 4, kind: input, shape index: {}]   ;;  %s2266_s5 = inlined_call_operand.vmem [shape: f32[32,1], index: 5, kind: input, shape index: {}]   ;;  %s2267_s6 = inlined_call_operand.vmem [shape: f32[32,1], index: 6, kind: input, shape index: {}]   ;;  %s2268_s7 = inlined_call_operand.vmem [shape: bf16[9,1,256], index: 7, kind: input, shape index: {}]   ;;  %s2269_s8 = inlined_call_operand.vmem [shape: f32[2,32,256], index: 8, kind: output, shape index: {}]  }
   0x1 LB: > { %s1670_s28 = sadd.s32 4294967295, %s1767_s27   ;;  %p1674_p0 = scmp.ge.s32.totalorder %s1767_s27, 1  ;;  %s1767_s27 = sphi %s1824_s27, %s18_s27  }
   0x2   : > { %p262_p1 = scmp.lt.s32.totalorder %s1767_s27, 3 }
   0x4   : > { %p263_p2 = pnand %p1674_p0, %p262_p1 }
   0x5   : > { %v1687_v0 = vld.sshfl [vmem:[%s2268_s7 + $0x4] sm:$0x11 pattern:$0x75316420] (!%p263_p2)  ;;  %v349_v1 = vlaneseq (!%p263_p2)  ;;  %v1769_v2 = vmov (!%p263_p2), 1966171168  }
   0x6   : > { %266 = sbr.rel (%p263_p2) target bundleno = 949 (0x3b5), region = 52  ;;  %v347_v3 = vunpack.c.l.s4 (!%p263_p2), %v1769_v2  ;;  %v1686_v4 = vld.sshfl [vmem:[%s2268_s7] sm:$0x11 pattern:$0x75316420] (!%p263_p2)  ;;  %v434_v8 = vcombine.high (!%p263_p2), %v1687_v0, %v1687_v0  ;;  %p296_p3 = scmp.lt.s32.totalorder (!%p263_p2), %s1670_s28, 1 }
   0x7   : > { %v350_v5 = vshrl.u32 (!%p263_p2), %v349_v1, 7  ;;  %v1688_v6 = vld.sshfl [vmem:[%s2268_s7 + $0x6] sm:$0x11 pattern:$0x75316420] (!%p263_p2)  ;;  %v345_v9 = vcombine.high (!%p263_p2), %v1686_v4, %v1686_v4  ;;  %v1770_v19 = vmov (!%p263_p2), 0  }
   0x8   : > { %v348_v7 = vunpack.c.0.s8 (!%p263_p2), %v347_v3  ;;  %v504_v10 = vcombine.high (!%p263_p2), %v1688_v6, %v1688_v6  ;;  %v1689_v12 = vld.sshfl [vmem:[%s2268_s7 + $0xa] sm:$0x11 pattern:$0x75316420] (!%p263_p2)  ;;  %1733 = vset.pattern.permute.xlu1 (!%p263_p2), %v1770_v19  ;;  %1732 = vset.pattern.permute.xlu0 (!%p263_p2), %v1770_v19  ;;  %s1771_s21 = smov (!%p263_p2), 113   ;;  %s1772_s22 = smov (!%p263_p2), 111  }
   0x9   : > { %v365_v13 = vsub.s32 (!%p263_p2), 0, %v350_v5  ;;  %v1690_v18 = vld.sshfl [vmem:[%s2268_s7 + $0xc] sm:$0x11 pattern:$0x75316420] (!%p263_p2)  ;;  %v578_v22 = vcombine.high (!%p263_p2), %v1689_v12, %v1689_v12  ;;  %s1773_s25 = smov (!%p263_p2), 127  }
   0xa   : > { %v351_v11 = vsub.s32 (!%p263_p2), %v348_v7, %v350_v5  ;;  %v646_v32 = vcombine.high (!%p263_p2), %v1690_v18, %v1690_v18  ;;  %v1691_v36 = vld.sshfl [vmem:[%s2268_s7 + $0x10] sm:$0x11 pattern:$0x75316420] (!%p263_p2)  ;;  %s1774_s26 = smov (!%p263_p2), 1   ;;  %s1775_s29 = smov (!%p263_p2), 15  }
   0xb   : > { %v733_v40 = vcombine.high (!%p263_p2), %v1691_v36, %v1691_v36  ;;  %s1776_s30 = smov (!%p263_p2), 17   ;;  %s1777_s9 = smov (!%p263_p2), 16   ;;  %vm380_vm0 = vcmask (!%p263_p2), 908288   ;;  %vm469_vm1 = vcmask (!%p263_p2), 924672   ;;  %vm539_vm2 = vcmask (!%p263_p2), 1039360  }
   0xc   : > { %v441_v14 = vrot.slane (!%p263_p2), %v1687_v0, %v351_v11  ;;  %v352_v15 = vrot.slane (!%p263_p2), %v1686_v4, %v351_v11  ;;  %v448_v16 = vrot.slane (!%p263_p2), %v434_v8, %v351_v11  ;;  %v359_v17 = vrot.slane (!%p263_p2), %v345_v9, %v351_v11  ;;  %s1778_s12 = smov (!%p263_p2), 112  }
   0xd   : > { %s2271_s28 = smov (!%p296_p3, %s1670_s28), 1  ;;  %v518_v20 = vrot.slane %v504_v10, %v351_v11  ;;  %v511_v21 = vrot.slane %v1688_v6, %v351_v11  ;;  %v592_v30 = vrot.slane %v578_v22, %v351_v11  ;;  %v585_v31 = vrot.slane %v1689_v12, %v351_v11 }
   0xe   : > { %v450_v23 = vpack.i.b16 %v441_v14, %v441_v14  ;;  %v361_v24 = vpack.i.b16 %v352_v15, %v352_v15  ;;  %v457_v25 = vpack.i.b16 %v448_v16, %v448_v16  ;;  %v368_v26 = vpack.i.b16 %v359_v17, %v359_v17  ;;  %s1704_s17 = sshll.u32 %s2271_s28, 4  ;;  %s1705_s13 = sshll.u32 %s2271_s28, 6 }
   0xf   : > { %s1855_s20 = scalar_lea.vmem %s2261_s0, %s1704_s17  ;;  %v527_v29 = vpack.i.b16 %v518_v20, %v518_v20  ;;  %v520_v35 = vpack.i.b16 %v511_v21, %v511_v21  ;;  %v601_v38 = vpack.i.b16 %v592_v30, %v592_v30  ;;  %v594_v39 = vpack.i.b16 %v585_v31, %v585_v31 }
  0x10   : > { %v455_v27 = vrot.slane %v450_v23, %v365_v13  ;;  %v366_v28 = vrot.slane %v361_v24, %v365_v13  ;;  %v462_v33 = vrot.slane %v457_v25, %v365_v13  ;;  %v373_v34 = vrot.slane %v368_v26, %v365_v13  ;;  %v1873_v56 = vld [vmem:[%s1855_s20] ss:$8 sps:$4 sm:$0xff]   ;;  %v1876_v57 = vld [vmem:[%s1855_s20 + $0x4] ss:$8 sps:$4 sm:$0xff]  }
  0x11   : > { %v532_v37 = vrot.slane %v527_v29, %v365_v13  ;;  %v525_v41 = vrot.slane %v520_v35, %v365_v13  ;;  %v660_v42 = vrot.slane %v646_v32, %v351_v11  ;;  %v653_v43 = vrot.slane %v1690_v18, %v351_v11  ;;  %v914_v32 = vld [vmem:[%s2263_s2 + $0x8] sm:$0xff] }
  0x12   : > { %465 = vrot.lane.b32.xlu1 %v455_v27, %s1771_s21  ;;  %376 = vrot.lane.b32.xlu0 %v366_v28, %s1772_s22  ;;  %v606_v44 = vrot.slane %v601_v38, %v365_v13  ;;  %v599_v45 = vrot.slane %v594_v39, %v365_v13  ;;  %v747_v46 = vrot.slane %v733_v40, %v351_v11  ;;  %vm556_vm3 = vcmask 7168   ;;  %v1749_v28 = vld [vmem:[%s2262_s1 + $0x4] ss:$8 sps:$4 sm:$0xff]   ;;  %v947_v38 = vld [vmem:[%s2264_s3 + $0x10] sm:$0xff] }
  0x13   : > { %v669_v47 = vpack.i.b16 %v660_v42, %v660_v42  ;;  %v662_v48 = vpack.i.b16 %v653_v43, %v653_v43  ;;  %v740_v49 = vrot.slane %v1691_v36, %v351_v11  ;;  %vm486_vm4 = vcmask 121856   ;;  %892 = vmatprep.mubr.bf16.mxu0 %v1749_v28  ;;  %v946_v35 = vld [vmem:[%s2264_s3 + $0x8] sm:$0xff]  ;;  %v915_v36 = vld [vmem:[%s2263_s2 + $0x10] sm:$0xff]  ;;  %v948_v39 = vld [vmem:[%s2264_s3 + $0x18] sm:$0xff] }
  0x14   : > { %v756_v50 = vpack.i.b16 %v747_v46, %v747_v46  ;;  %vm397_vm5 = vcmask 138240   ;;  %vm416_vm6 = vcmask 130048   ;;  %vm715_vm7 = vcmask 916480  }
  0x15   : > { %v674_v51 = vrot.slane %v669_v47, %v365_v13  ;;  %v667_v52 = vrot.slane %v662_v48, %v365_v13  ;;  %v749_v53 = vpack.i.b16 %v740_v49, %v740_v49 }
  0x16   : > { %467 = vrot.lane.b32.xlu1 %v462_v33, %s1771_s21  ;;  %378 = vrot.lane.b32.xlu0 %v373_v34, %s1772_s22  ;;  %v761_v54 = vrot.slane %v756_v50, %v365_v13  ;;  %v913_v33 = vld [vmem:[%s2263_s2] sm:$0xff] }
  0x17   : > { %v754_v55 = vrot.slane %v749_v53, %v365_v13  ;;  %v945_v34 = vld [vmem:[%s2264_s3] sm:$0xff] }
  0x1a   : > { %537 = vrot.lane.b32.xlu1 %v532_v37, %s1773_s25  ;;  %535 = vrot.lane.b32.xlu0 %v525_v41, %s1773_s25  ;;  %v916_v37 = vld [vmem:[%s2263_s2 + $0x18] sm:$0xff] }
  0x1e   : > { %611 = vrot.lane.b32.xlu1 %v606_v44, %s1774_s26  ;;  %609 = vrot.lane.b32.xlu0 %v599_v45, %s1774_s26 }
  0x22   : > { %679 = vrot.lane.b32.xlu1 %v674_v51, %s1775_s29  ;;  %677 = vrot.lane.b32.xlu0 %v667_v52, %s1775_s29 }
  0x26   : > { %766 = vrot.lane.b32.xlu1 %v761_v54, %s1776_s30  ;;  %764 = vrot.lane.b32.xlu0 %v754_v55, %s1776_s30 }
  0x2a   : > { %412 = vrot.lane.b32.xlu1 %v1873_v56, %s1777_s9  ;;  %414 = vrot.lane.b32.xlu0 %v1876_v57, %s1777_s9 }
  0x2e   : > { %410 = vrot.lane.b32.xlu1 %v1770_v19, %s1777_s9 }
  0x84   : > { %v466_v58 = vpop.permute.xlu1 %465  ;;  %v377_v59 = vpop.permute.xlu0 %376 }
  0x85   : > { %v1884_v60 = vmul.bf16 0, %v377_v59  ;;  %v1886_v61 = vmul.bf16 0, %v466_v58 }
  0x87   : > { %391 = vrot.lane.b32.xlu0 %v1884_v60, %s1776_s30 }
  0x88   : > { %v1890_v62 = vpop.permute.xlu1 %467  ;;  %v1892_v63 = vpop.permute.xlu0 %378 }
  0x89   : > { %v387_v0 = vmul.bf16 %v1876_v57, %v1892_v63  ;;  %v1898_v1 = vsel %vm380_vm0, %v377_v59, %v1892_v63  ;;  %v476_v2 = vmul.bf16 %v1876_v57, %v1890_v62  ;;  %v1917_v8 = vsel %vm469_vm1, %v466_v58, %v1890_v62 }
  0x8a   : > { %v386_v5 = vmul.bf16 %v1873_v56, %v1898_v1  ;;  %v475_v13 = vmul.bf16 %v1873_v56, %v1917_v8 }
  0x8b   : > { %480 = vrot.lane.b32.xlu0 %v1886_v61, %s1775_s29  ;;  %395 = vrot.lane.b32.xlu1 %v387_v0, %s1776_s30 }
  0x8c   : > { %v1905_v3 = vpop.permute.xlu1 %537  ;;  %v536_v4 = vpop.permute.xlu0 %535 }
  0x8d   : > { %v1911_v6 = vmul.bf16 0, %v536_v4  ;;  %v546_v7 = vmul.bf16 %v1876_v57, %v1905_v3  ;;  %v1921_v9 = vsel %vm539_vm2, %v536_v4, %v1905_v3 }
  0x8e   : > { %v545_v12 = vmul.bf16 %v1873_v56, %v1921_v9 }
  0x8f   : > { %484 = vrot.lane.b32.xlu1 %v476_v2, %s1775_s29  ;;  %393 = vrot.lane.b32.xlu0 %v386_v5, %s1776_s30 }
  0x90   : > { %v612_v10 = vpop.permute.xlu1 %611  ;;  %v1923_v11 = vpop.permute.xlu0 %609 }
  0x91   : > { %v1934_v14 = vmul.bf16 0, %v612_v10  ;;  %v617_v15 = vmul.bf16 %v1873_v56, %v1923_v11  ;;  %v1949_v21 = vsel %vm556_vm3, %v1923_v11, %v612_v10 }
  0x92   : > { %v618_v24 = vmul.bf16 %v1876_v57, %v1949_v21 }
  0x93   : > { %550 = vrot.lane.b32.xlu1 %v1911_v6, %s1774_s26  ;;  %554 = vrot.lane.b32.xlu0 %v546_v7, %s1774_s26 }
  0x94   : > { %v680_v16 = vpop.permute.xlu1 %679  ;;  %v1938_v17 = vpop.permute.xlu0 %677 }
  0x95   : > { %v1943_v18 = vmul.bf16 0, %v680_v16  ;;  %v685_v20 = vmul.bf16 %v1873_v56, %v1938_v17  ;;  %v1953_v22 = vsel %vm486_vm4, %v1938_v17, %v680_v16 }
  0x96   : > { %v686_v23 = vmul.bf16 %v1876_v57, %v1953_v22 }
  0x97   : > { %552 = vrot.lane.b32.xlu1 %v545_v12, %s1774_s26  ;;  %482 = vrot.lane.b32.xlu0 %v475_v13, %s1775_s29 }
  0x98   : > { %v767_v25 = vpop.permute.xlu1 %766  ;;  %v1962_v26 = vpop.permute.xlu0 %764 }
  0x99   : > { %v1968_v27 = vsel %vm397_vm5, %v1962_v26, %v767_v25  ;;  %v1982_v30 = vmul.bf16 0, %v767_v25  ;;  %v772_v31 = vmul.bf16 %v1873_v56, %v1962_v26 }
  0x9a   : > { %v773_v29 = vmul.bf16 %v1876_v57, %v1968_v27 }
  0x9b   : > { %627 = vrot.lane.b32.xlu1 %v1934_v14, %s1773_s25  ;;  %623 = vrot.lane.b32.xlu0 %v617_v15, %s1773_s25 }
  0x9c   : > { %v413_v40 = vpop.permute.xlu1 %412  ;;  %v415_v41 = vpop.permute.xlu0 %414 }
  0x9d   : > { %v418_v50 = vsel %vm416_vm6, %v413_v40, %v415_v41 }
  0x9f   : > { %691 = vrot.lane.b32.xlu1 %v685_v20, %s1771_s21  ;;  %695 = vrot.lane.b32.xlu0 %v1943_v18, %s1771_s21 }
  0xa0   : > { %v411_v42 = vpop.permute.xlu1 %410 }
  0xa1   : > { %v417_v53 = vsel %vm416_vm6, %v411_v42, %v413_v40 }
  0xa3   : > { %693 = vrot.lane.b32.xlu1 %v686_v23, %s1771_s21  ;;  %625 = vrot.lane.b32.xlu0 %v618_v24, %s1773_s25 }
  0xa7   : > { %713 = vrot.lane.b32.xlu1 %v1770_v19, %s1778_s12  ;;  %711 = vrot.lane.b32.xlu0 %v1876_v57, %s1778_s12 }
  0xab   : > { %780 = vrot.lane.b32.xlu1 %v773_v29, %s1772_s22  ;;  %709 = vrot.lane.b32.xlu0 %v1873_v56, %s1778_s12 }
  0xaf   : > { %778 = vrot.lane.b32.xlu1 %v772_v31, %s1772_s22  ;;  %782 = vrot.lane.b32.xlu0 %v1982_v30, %s1772_s22 }
  0xb3   : > { %924 = vperm.xlu1 %1733, %v914_v32   ;;  %919 = vperm.xlu0 %1732, %v913_v33  }
  0xb7   : > { %951 = vperm.xlu1 %1733, %v945_v34   ;;  %956 = vperm.xlu0 %1732, %v946_v35   ;;  %v1747_v34 = vld [vmem:[%s2262_s1] ss:$8 sps:$4 sm:$0xff]   ;;  %v1750_v35 = vld [vmem:[%s2262_s1 + $0x14] ss:$8 sps:$4 sm:$0xff]  }
  0xbb   : > { %929 = vperm.xlu1 %1733, %v915_v36   ;;  %934 = vperm.xlu0 %1732, %v916_v37   ;;  %v1752_v36 = vld [vmem:[%s2262_s1 + $0x10] ss:$8 sps:$4 sm:$0xff]  }
  0xbf   : > { %961 = vperm.xlu1 %1733, %v947_v38   ;;  %966 = vperm.xlu0 %1732, %v948_v39  }
  0xc3   : > { %1015 = vrot.lane.b32.xlu1 %v1884_v60, %s1776_s30  ;;  %1021 = vrot.lane.b32.xlu0 %v1884_v60, %s1776_s30 }
  0xc7   : > { %1093 = vrot.lane.b32.xlu0 %v1886_v61, %s1775_s29  ;;  %1735 = vrot.lane.b32.xlu1 %v1770_v19, %s1777_s9 }
  0xf9   : > { %v392_v43 = vpop.permute.xlu0 %391 }
  0xfd   : > { %v481_v44 = vpop.permute.xlu0 %480  ;;  %v396_v45 = vpop.permute.xlu1 %395 }
 0x101   : > { %v485_v46 = vpop.permute.xlu1 %484  ;;  %v394_v47 = vpop.permute.xlu0 %393 }
 0x102   : > { %v399_v48 = vsel %vm397_vm5, %v394_v47, %v396_v45  ;;  %v398_v49 = vsel %vm397_vm5, %v392_v43, %v394_v47 }
 0x103   : > { %860 = vmatprep.subr.bf16.mxu0 %v399_v48 }
 0x104   : > { %861 = vmatpush1.bf16.msra.mxu0 %v398_v49 }
 0x105   : > { %v551_v51 = vpop.permute.xlu1 %550  ;;  %862 = vmatprep.subr.bf16.mxu0 %v418_v50  ;;  %v555_v52 = vpop.permute.xlu0 %554 }
 0x108   : > { %863 = vmatpush1.bf16.msra.mxu0 %v417_v53 }
 0x109   : > { %v553_v54 = vpop.permute.xlu1 %552  ;;  %v483_v55 = vpop.permute.xlu0 %482 }
 0x10a   : > { %v488_v58 = vsel %vm486_vm4, %v483_v55, %v485_v46  ;;  %v487_v59 = vsel %vm486_vm4, %v481_v44, %v483_v55  ;;  %v558_v60 = vsel %vm556_vm3, %v553_v54, %v555_v52  ;;  %v557_v4 = vsel %vm556_vm3, %v551_v51, %v553_v54 }
 0x10b   : > { %864 = vmatprep.subr.bf16.mxu0 %v488_v58 }
 0x10c   : > { %865 = vmatpush1.bf16.msra.mxu0 %v487_v59 }
 0x10d   : > { %v628_v0 = vpop.permute.xlu1 %627  ;;  %866 = vmatprep.subr.bf16.mxu0 %v558_v60  ;;  %v624_v2 = vpop.permute.xlu0 %623 }
 0x110   : > { %867 = vmatpush1.bf16.msra.mxu0 %v557_v4 }
 0x111   : > { %v692_v5 = vpop.permute.xlu1 %691  ;;  %v696_v7 = vpop.permute.xlu0 %695  ;;  %868 = vmatprep.subr.bf16.mxu0 %v1876_v57 }
 0x114   : > { %869 = vmatpush1.bf16.msra.mxu0 %v1873_v56 }
 0x115   : > { %v694_v10 = vpop.permute.xlu1 %693  ;;  %v626_v12 = vpop.permute.xlu0 %625 }
 0x116   : > { %v630_v13 = vsel %vm539_vm2, %v626_v12, %v628_v0  ;;  %v629_v15 = vsel %vm539_vm2, %v624_v2, %v626_v12  ;;  %v698_v16 = vsel %vm469_vm1, %v694_v10, %v696_v7  ;;  %v697_v24 = vsel %vm469_vm1, %v692_v5, %v694_v10 }
 0x117   : > { %870 = vmatprep.subr.bf16.mxu0 %v630_v13 }
 0x118   : > { %871 = vmatpush1.bf16.msra.mxu0 %v629_v15 }
 0x119   : > { %v714_v20 = vpop.permute.xlu1 %713  ;;  %872 = vmatprep.subr.bf16.mxu0 %v698_v16  ;;  %v712_v23 = vpop.permute.xlu0 %711 }
 0x11a   : > { %v717_v57 = vsel %vm715_vm7, %v712_v23, %v714_v20 }
 0x11c   : > { %873 = vmatpush1.bf16.msra.mxu0 %v697_v24 }
 0x11d   : > { %v781_v56 = vpop.permute.xlu1 %780  ;;  %874 = vmatprep.subr.bf16.mxu0 %v717_v57  ;;  %v710_v25 = vpop.permute.xlu0 %709 }
 0x11e   : > { %v716_v28 = vsel %vm715_vm7, %v710_v25, %v712_v23 }
 0x120   : > { %875 = vmatpush1.bf16.msra.mxu0 %v716_v28 }
 0x121   : > { %v779_v29 = vpop.permute.xlu1 %778  ;;  %v783_v31 = vpop.permute.xlu0 %782 }
 0x122   : > { %v785_v32 = vsel %vm380_vm0, %v781_v56, %v783_v31  ;;  %v784_v33 = vsel %vm380_vm0, %v779_v29, %v781_v56 }
 0x123   : > { %876 = vmatprep.subr.bf16.mxu0 %v785_v32 }
 0x124   : > { %877 = vmatpush1.bf16.msra.mxu0 %v784_v33 }
 0x127   : > { %893 = vmatmul.mubr.bf16.vlgmr.msra.gmra.mrb[0].mxu0 %v1747_v34 }
 0x128   : > { %902 = vmatprep.mubr.bf16.mxu0 %v1750_v35 }
 0x12f   : > { %903 = vmatmul.mubr.bf16.gmra.mrb[4].mxu0 %v1752_v36 }
 0x130   : > { %1514 = vmatprep.mubr.bf16.mxu0 %v1770_v19 }
 0x132   : > { %v925_v37 = vpop.permute.xlu1 %924  ;;  %v920_v38 = vpop.permute.xlu0 %919 }
 0x136   : > { %v952_v39 = vpop.permute.xlu1 %951  ;;  %v957_v40 = vpop.permute.xlu0 %956 }
 0x13a   : > { %v930_v49 = vpop.permute.xlu1 %929  ;;  %v935_v53 = vpop.permute.xlu0 %934 }
 0x13e   : > { %v962_v7 = vpop.permute.xlu1 %961  ;;  %v967_v23 = vpop.permute.xlu0 %966 }
 0x1fa   : > { %v894_v41 = vpop.f32.mrb[0].mxu0 }
 0x1fb   : > { %v937_v42 = vmul.f32 %v920_v38, %v894_v41  ;;  %v896_v43 = vpop.f32.mrb[1].mxu0 }
 0x1fc   : > { %v938_v44 = vmul.f32 %v920_v38, %v896_v43  ;;  %v898_v45 = vpop.f32.mrb[2].mxu0 }
 0x1fd   : > { %v969_v46 = vadd.f32 %v952_v39, %v937_v42  ;;  %v939_v47 = vmul.f32 %v925_v37, %v898_v45  ;;  %v900_v48 = vpop.f32.mrb[3].mxu0 }
 0x1fe   : > { %v970_v50 = vadd.f32 %v952_v39, %v938_v44  ;;  %v940_v51 = vmul.f32 %v925_v37, %v900_v48  ;;  %v1568_v48 = vld [vmem:[%s2267_s6 + $0x8] sm:$0xff] }
 0x1ff   : > { %v971_v52 = vadd.f32 %v957_v40, %v939_v47  ;;  %v977_v55 = vmax.f32 %v969_v46, 0.0  ;;  %v1535_v46 = vld [vmem:[%s2266_s5] sm:$0xff] }
 0x200   : > { %v972_v54 = vadd.f32 %v957_v40, %v940_v51  ;;  %v978_v59 = vmax.f32 %v970_v50, 0.0  ;;  %v1567_v47 = vld [vmem:[%s2267_s6] sm:$0xff]  ;;  %v1570_v50 = vld [vmem:[%s2267_s6 + $0x18] sm:$0xff]  ;;  %v1016_v51 = vpop.permute.xlu1 %1015 }
 0x201   : > { %v979_v58 = vmax.f32 %v971_v52, 0.0  ;;  %v1022_v52 = vpop.permute.xlu0 %1021 }
 0x202   : > { %v980_v60 = vmax.f32 %v972_v54, 0.0  ;;  %v904_v0 = vpop.f32.mrb[4].mxu0 }
 0x203   : > { %v2049_v2 = vpack.c.bf16 %v979_v58, %v977_v55  ;;  %v941_v4 = vmul.f32 %v930_v49, %v904_v0  ;;  %v906_v5 = vpop.f32.mrb[5].mxu0 }
 0x204   : > { %v2051_v10 = vpack.c.bf16 %v980_v60, %v978_v59  ;;  %v942_v12 = vmul.f32 %v930_v49, %v906_v5  ;;  %v908_v13 = vpop.f32.mrb[6].mxu0  ;;  %v1569_v49 = vld [vmem:[%s2267_s6 + $0x10] sm:$0xff] }
 0x205   : > { %v973_v15 = vadd.f32 %v962_v7, %v941_v4  ;;  %v943_v16 = vmul.f32 %v935_v53, %v908_v13  ;;  %v910_v20 = vpop.f32.mrb[7].mxu0  ;;  %1053 = vrot.lane.b32.xlu1 %v2049_v2, %s1777_s9  ;;  %v1004_v25 = vmul.bf16 %v2049_v2, %v1898_v1  ;;  %v1082_v29 = vmul.bf16 %v2049_v2, %v1917_v8  ;;  %v1094_v54 = vpop.permute.xlu0 %1093 }
 0x206   : > { %v974_v24 = vadd.f32 %v962_v7, %v942_v12  ;;  %v944_v57 = vmul.f32 %v935_v53, %v910_v20  ;;  %1055 = vrot.lane.b32.xlu0 %v2051_v10, %s1777_s9  ;;  %v1083_v36 = vmul.bf16 %v2051_v10, %v1890_v62  ;;  %v1005_v38 = vmul.bf16 %v2051_v10, %v1892_v63  ;;  %v1736_v53 = vpop.permute.xlu1 %1735 }
 0x207   : > { %v975_v56 = vadd.f32 %v967_v23, %v943_v16  ;;  %v981_v31 = vmax.f32 %v973_v15, 0.0  ;;  %v1124_v42 = vmul.bf16 %v2049_v2, %v1921_v9  ;;  %v1173_v43 = vmul.bf16 %v2049_v2, %v1923_v11 }
 0x208   : > { %v976_v28 = vadd.f32 %v967_v23, %v944_v57  ;;  %v982_v33 = vmax.f32 %v974_v24, 0.0  ;;  %v1737_v57 = vunpack.i.l.bf16 %v1736_v53 }
 0x209   : > { %v983_v32 = vmax.f32 %v975_v56, 0.0  ;;  %1017 = vrot.lane.b32.xlu1 %v1004_v25, %s1776_s30 }
 0x20a   : > { %v984_v34 = vmax.f32 %v976_v28, 0.0  ;;  %1095 = vrot.lane.b32.xlu0 %v1082_v29, %s1775_s29 }
 0x20b   : > { %v2063_v35 = vpack.c.bf16 %v983_v32, %v981_v31 }
 0x20c   : > { %v2067_v37 = vpack.c.bf16 %v984_v34, %v982_v33  ;;  %v1738_v33 = vunpack.i.h.bf16 %v1736_v53 }
 0x20d   : > { %1097 = vrot.lane.b32.xlu1 %v1083_v36, %s1775_s29  ;;  %v1085_v39 = vmul.bf16 %v2063_v35, %v1917_v8  ;;  %v1007_v40 = vmul.bf16 %v2063_v35, %v1898_v1  ;;  %v1125_v1 = vmul.bf16 %v2051_v10, %v1905_v3  ;;  %v1174_v8 = vmul.bf16 %v2051_v10, %v1949_v21 }
 0x20e   : > { %1019 = vrot.lane.b32.xlu0 %v1005_v38, %s1776_s30  ;;  %v1008_v41 = vmul.bf16 %v2067_v37, %v1892_v63  ;;  %v1127_v63 = vmul.bf16 %v2063_v35, %v1921_v9  ;;  %v1176_v9 = vmul.bf16 %v2063_v35, %v1923_v11  ;;  %v1128_v44 = vmul.bf16 %v2067_v37, %v1905_v3 }
 0x20f   : > { %v1215_v11 = vmul.bf16 %v2049_v2, %v1938_v17  ;;  %v1177_v3 = vmul.bf16 %v2067_v37, %v1949_v21  ;;  %v1293_v21 = vmul.bf16 %v2049_v2, %v1962_v26  ;;  %v1296_v45 = vmul.bf16 %v2063_v35, %v1962_v26  ;;  %v1538_v26 = vld [vmem:[%s2266_s5 + $0x18] sm:$0xff] }
 0x211   : > { %1061 = vrot.lane.b32.xlu1 %v2067_v37, %s1777_s9 }
 0x212   : > { %1059 = vrot.lane.b32.xlu0 %v2063_v35, %s1777_s9 }
 0x215   : > { %1101 = vrot.lane.b32.xlu1 %v1085_v39, %s1775_s29 }
 0x216   : > { %1023 = vrot.lane.b32.xlu0 %v1007_v40, %s1776_s30 }
 0x219   : > { %1025 = vrot.lane.b32.xlu1 %v1008_v41, %s1776_s30 }
 0x21a   : > { %1137 = vrot.lane.b32.xlu0 %v1124_v42, %s1774_s26 }
 0x21d   : > { %1099 = vrot.lane.b32.xlu1 %v1886_v61, %s1775_s29  ;;  %v1086_v61 = vmul.bf16 %v2067_v37, %v1890_v62  ;;  %v1216_v62 = vmul.bf16 %v2051_v10, %v1953_v22 }
 0x21e   : > { %1135 = vrot.lane.b32.xlu0 %v1911_v6, %s1774_s26 }
 0x221   : > { %1139 = vrot.lane.b32.xlu1 %v1125_v1, %s1774_s26 }
 0x222   : > { %1187 = vrot.lane.b32.xlu0 %v1174_v8, %s1773_s25 }
 0x225   : > { %1143 = vrot.lane.b32.xlu1 %v1127_v63, %s1774_s26 }
 0x226   : > { %1185 = vrot.lane.b32.xlu0 %v1173_v43, %s1773_s25 }
 0x229   : > { %1141 = vrot.lane.b32.xlu1 %v1911_v6, %s1774_s26  ;;  %v1218_v6 = vmul.bf16 %v2063_v35, %v1938_v17  ;;  %v1219_v17 = vmul.bf16 %v2067_v37, %v1953_v22  ;;  %v1297_v22 = vmul.bf16 %v2067_v37, %v1968_v27 }
 0x22a   : > { %1103 = vrot.lane.b32.xlu0 %v1086_v61, %s1775_s29 }
 0x22d   : > { %1189 = vrot.lane.b32.xlu1 %v1934_v14, %s1773_s25 }
 0x22e   : > { %1195 = vrot.lane.b32.xlu0 %v1934_v14, %s1773_s25  ;;  %v1294_v14 = vmul.bf16 %v2051_v10, %v1968_v27  ;;  %v1536_v27 = vld [vmem:[%s2266_s5 + $0x8] sm:$0xff] }
 0x231   : > { %1191 = vrot.lane.b32.xlu1 %v1176_v9, %s1773_s25 }
 0x232   : > { %1145 = vrot.lane.b32.xlu0 %v1128_v44, %s1774_s26 }
 0x235   : > { %1231 = vrot.lane.b32.xlu1 %v1943_v18, %s1771_s21 }
 0x236   : > { %1229 = vrot.lane.b32.xlu0 %v1216_v62, %s1771_s21 }
 0x239   : > { %1233 = vrot.lane.b32.xlu1 %v1218_v6, %s1771_s21 }
 0x23a   : > { %1227 = vrot.lane.b32.xlu0 %v1215_v11, %s1771_s21 }
 0x23d   : > { %1740 = vrot.lane.b32.xlu1 %v1770_v19, %s1778_s12 }
 0x23e   : > { %1237 = vrot.lane.b32.xlu0 %v1943_v18, %s1771_s21  ;;  %v1755_v18 = vld [vmem:[%s2265_s4 + $0x4] ss:$12 sps:$4 sm:$0xff]  }
 0x23f   : > { %1461 = vmatprep.mubr.bf16.mxu1 %v1755_v18 }
 0x241   : > { %1193 = vrot.lane.b32.xlu1 %v1177_v3, %s1773_s25 }
 0x242   : > { %1265 = vrot.lane.b32.xlu0 %v2051_v10, %s1778_s12 }
 0x245   : > { %1309 = vrot.lane.b32.xlu1 %v1982_v30, %s1772_s22 }
 0x246   : > { %1307 = vrot.lane.b32.xlu0 %v1294_v14, %s1772_s22 }
 0x249   : > { %1235 = vrot.lane.b32.xlu1 %v1219_v17, %s1771_s21 }
 0x24a   : > { %1263 = vrot.lane.b32.xlu0 %v2049_v2, %s1778_s12 }
 0x24d   : > { %1305 = vrot.lane.b32.xlu1 %v1293_v21, %s1772_s22 }
 0x24e   : > { %1271 = vrot.lane.b32.xlu0 %v2067_v37, %s1778_s12 }
 0x251   : > { %1313 = vrot.lane.b32.xlu1 %v1297_v22, %s1772_s22 }
 0x252   : > { %1315 = vrot.lane.b32.xlu0 %v1982_v30, %s1772_s22  ;;  %v1537_v30 = vld [vmem:[%s2266_s5 + $0x10] sm:$0xff] }
 0x255   : > { %1269 = vrot.lane.b32.xlu1 %v2063_v35, %s1778_s12  ;;  %s2248_s12 = scalar_lea.vmem %s2269_s8, %s1705_s13 }
 0x256   : > { %1311 = vrot.lane.b32.xlu0 %v1296_v45, %s1772_s22 }
 0x259   : > { %1541 = vperm.xlu1 %1733, %v1535_v46  }
 0x25a   : > { %1546 = vperm.xlu0 %1732, %v1536_v27  }
 0x25d   : > { %1551 = vperm.xlu1 %1733, %v1537_v30  }
 0x25e   : > { %1556 = vperm.xlu0 %1732, %v1538_v26  }
 0x261   : > { %1573 = vperm.xlu1 %1733, %v1567_v47  }
 0x262   : > { %1578 = vperm.xlu0 %1732, %v1568_v48  }
 0x265   : > { %1583 = vperm.xlu1 %1733, %v1569_v49  }
 0x266   : > { %1588 = vperm.xlu0 %1732, %v1570_v50  }
 0x277   : > { %v1054_v55 = vpop.permute.xlu1 %1053 }
 0x278   : > { %v1056_v58 = vpop.permute.xlu0 %1055  ;;  %v1063_v31 = vsel %vm416_vm6, %v1737_v57, %v1054_v55 }
 0x279   : > { %v1064_v25 = vsel %vm416_vm6, %v1054_v55, %v1056_v58 }
 0x27b   : > { %v1018_v59 = vpop.permute.xlu1 %1017 }
 0x27c   : > { %v1096_v60 = vpop.permute.xlu0 %1095  ;;  %v1027_v7 = vsel %vm397_vm5, %v1016_v51, %v1018_v59 }
 0x27d   : > { %v1105_v42 = vsel %vm486_vm4, %v1094_v54, %v1096_v60 }
 0x27f   : > { %v1098_v0 = vpop.permute.xlu1 %1097 }
 0x280   : > { %v1020_v4 = vpop.permute.xlu0 %1019  ;;  %v1106_v39 = vsel %vm486_vm4, %v1096_v60, %v1098_v0 }
 0x281   : > { %v1028_v5 = vsel %vm397_vm5, %v1018_v59, %v1020_v4 }
 0x282   : > { %1429 = vmatprep.subr.bf16.mxu1 %v1028_v5 }
 0x283   : > { %v1062_v12 = vpop.permute.xlu1 %1061  ;;  %1430 = vmatpush1.bf16.msra.mxu1 %v1027_v7 }
 0x284   : > { %v1060_v13 = vpop.permute.xlu0 %1059 }
 0x285   : > { %v1066_v32 = vsel %vm416_vm6, %v1060_v13, %v1062_v12  ;;  %v1065_v38 = vsel %vm416_vm6, %v1738_v33, %v1060_v13 }
 0x287   : > { %v1102_v15 = vpop.permute.xlu1 %1101 }
 0x288   : > { %v1024_v16 = vpop.permute.xlu0 %1023 }
 0x289   : > { %v1029_v56 = vsel %vm397_vm5, %v1022_v52, %v1024_v16 }
 0x28b   : > { %v1026_v20 = vpop.permute.xlu1 %1025 }
 0x28c   : > { %v1138_v23 = vpop.permute.xlu0 %1137  ;;  %v1030_v24 = vsel %vm397_vm5, %v1024_v16, %v1026_v20 }
 0x28d   : > { %1431 = vmatprep.subr.bf16.mxu1 %v1030_v24  ;;  %v1753_v24 = vld [vmem:[%s2265_s4] ss:$12 sps:$4 sm:$0xff]  }
 0x28e   : > { %1432 = vmatpush1.bf16.msra.mxu1 %v1029_v56  ;;  %v1756_v56 = vld [vmem:[%s2265_s4 + $0x8] ss:$12 sps:$4 sm:$0xff]  }
 0x28f   : > { %v1100_v28 = vpop.permute.xlu1 %1099  ;;  %1433 = vmatprep.subr.bf16.mxu1 %v1064_v25  ;;  %v1757_v25 = vld [vmem:[%s2265_s4 + $0x1c] ss:$12 sps:$4 sm:$0xff]  }
 0x290   : > { %v1136_v29 = vpop.permute.xlu0 %1135  ;;  %v1107_v43 = vsel %vm486_vm4, %v1100_v28, %v1102_v15  ;;  %v1759_v28 = vld [vmem:[%s2265_s4 + $0x18] ss:$12 sps:$4 sm:$0xff]  }
 0x291   : > { %v1147_v62 = vsel %vm556_vm3, %v1136_v29, %v1138_v23  ;;  %v1760_v29 = vld [vmem:[%s2265_s4 + $0x20] ss:$12 sps:$4 sm:$0xff]  }
 0x292   : > { %1434 = vmatpush1.bf16.msra.mxu1 %v1063_v31 }
 0x293   : > { %v1140_v34 = vpop.permute.xlu1 %1139  ;;  %1435 = vmatprep.subr.bf16.mxu1 %v1066_v32 }
 0x294   : > { %v1188_v36 = vpop.permute.xlu0 %1187  ;;  %v1148_v9 = vsel %vm556_vm3, %v1138_v23, %v1140_v34 }
 0x296   : > { %1436 = vmatpush1.bf16.msra.mxu1 %v1065_v38 }
 0x297   : > { %v1144_v40 = vpop.permute.xlu1 %1143  ;;  %1437 = vmatprep.subr.bf16.mxu1 %v1106_v39 }
 0x298   : > { %v1186_v41 = vpop.permute.xlu0 %1185 }
 0x299   : > { %v1197_v30 = vsel %vm539_vm2, %v1186_v41, %v1188_v36 }
 0x29a   : > { %1438 = vmatpush1.bf16.msra.mxu1 %v1105_v42 }
 0x29b   : > { %v1142_v1 = vpop.permute.xlu1 %1141 }
 0x29c   : > { %v1104_v8 = vpop.permute.xlu0 %1103  ;;  %v1149_v14 = vsel %vm556_vm3, %v1142_v1, %v1144_v40 }
 0x29d   : > { %v1108_v63 = vsel %vm486_vm4, %v1102_v15, %v1104_v8 }
 0x29e   : > { %1439 = vmatprep.subr.bf16.mxu1 %v1108_v63 }
 0x29f   : > { %v1190_v61 = vpop.permute.xlu1 %1189  ;;  %1440 = vmatpush1.bf16.msra.mxu1 %v1107_v43 }
 0x2a0   : > { %1441 = vmatprep.subr.bf16.mxu1 %v1148_v9  ;;  %v1196_v44 = vpop.permute.xlu0 %1195  ;;  %v1198_v46 = vsel %vm539_vm2, %v1188_v36, %v1190_v61 }
 0x2a3   : > { %v1192_v6 = vpop.permute.xlu1 %1191  ;;  %1442 = vmatpush1.bf16.msra.mxu1 %v1147_v62 }
 0x2a4   : > { %v1146_v11 = vpop.permute.xlu0 %1145 }
 0x2a5   : > { %v1150_v3 = vsel %vm556_vm3, %v1144_v40, %v1146_v11 }
 0x2a6   : > { %1443 = vmatprep.subr.bf16.mxu1 %v1150_v3 }
 0x2a7   : > { %v1232_v17 = vpop.permute.xlu1 %1231  ;;  %1444 = vmatpush1.bf16.msra.mxu1 %v1149_v14 }
 0x2a8   : > { %1445 = vmatprep.subr.bf16.mxu1 %v2051_v10  ;;  %v1230_v18 = vpop.permute.xlu0 %1229 }
 0x2ab   : > { %v1234_v21 = vpop.permute.xlu1 %1233  ;;  %1446 = vmatpush1.bf16.msra.mxu1 %v2049_v2 }
 0x2ac   : > { %1447 = vmatprep.subr.bf16.mxu1 %v2067_v37  ;;  %v1228_v22 = vpop.permute.xlu0 %1227  ;;  %v1240_v37 = vsel %vm469_vm1, %v1230_v18, %v1232_v17 }
 0x2ad   : > { %v1239_v50 = vsel %vm469_vm1, %v1228_v22, %v1230_v18 }
 0x2af   : > { %v1741_v45 = vpop.permute.xlu1 %1740  ;;  %1448 = vmatpush1.bf16.msra.mxu1 %v2063_v35 }
 0x2b0   : > { %1449 = vmatprep.subr.bf16.mxu1 %v1198_v46  ;;  %v1238_v27 = vpop.permute.xlu0 %1237  ;;  %v1742_v54 = vunpack.i.l.bf16 %v1741_v45  ;;  %v1743_v4 = vunpack.i.h.bf16 %v1741_v45 }
 0x2b3   : > { %v1194_v26 = vpop.permute.xlu1 %1193  ;;  %1450 = vmatpush1.bf16.msra.mxu1 %v1197_v30 }
 0x2b4   : > { %v1266_v47 = vpop.permute.xlu0 %1265  ;;  %v1200_v10 = vsel %vm539_vm2, %v1194_v26, %v1196_v44  ;;  %v1199_v2 = vsel %vm539_vm2, %v1192_v6, %v1194_v26 }
 0x2b5   : > { %1451 = vmatprep.subr.bf16.mxu1 %v1200_v10  ;;  %v1276_v59 = vsel %vm715_vm7, %v1266_v47, %v1742_v54 }
 0x2b7   : > { %v1310_v48 = vpop.permute.xlu1 %1309  ;;  %1452 = vmatpush1.bf16.msra.mxu1 %v1199_v2 }
 0x2b8   : > { %1453 = vmatprep.subr.bf16.mxu1 %v1240_v37  ;;  %v1308_v35 = vpop.permute.xlu0 %1307 }
 0x2b9   : > { %v1318_v49 = vsel %vm380_vm0, %v1308_v35, %v1310_v48 }
 0x2ba   : > { %1482 = vmatprep.subr.bf16.mxu0 %v1318_v49 }
 0x2bb   : > { %v1236_v51 = vpop.permute.xlu1 %1235  ;;  %1454 = vmatpush1.bf16.msra.mxu1 %v1239_v50 }
 0x2bc   : > { %v1264_v52 = vpop.permute.xlu0 %1263  ;;  %v1242_v53 = vsel %vm469_vm1, %v1236_v51, %v1238_v27  ;;  %v1241_v55 = vsel %vm469_vm1, %v1234_v21, %v1236_v51 }
 0x2bd   : > { %1455 = vmatprep.subr.bf16.mxu1 %v1242_v53  ;;  %v1275_v5 = vsel %vm715_vm7, %v1264_v52, %v1266_v47 }
 0x2bf   : > { %v1306_v58 = vpop.permute.xlu1 %1305  ;;  %1456 = vmatpush1.bf16.msra.mxu1 %v1241_v55 }
 0x2c0   : > { %v1317_v60 = vsel %vm380_vm0, %v1306_v58, %v1308_v35  ;;  %1457 = vmatprep.subr.bf16.mxu1 %v1276_v59  ;;  %v1272_v0 = vpop.permute.xlu0 %1271 }
 0x2c1   : > { %1483 = vmatpush1.bf16.msra.mxu0 %v1317_v60  ;;  %v1278_v12 = vsel %vm715_vm7, %v1272_v0, %v1743_v4 }
 0x2c3   : > { %v1314_v7 = vpop.permute.xlu1 %1313  ;;  %1458 = vmatpush1.bf16.msra.mxu1 %v1275_v5 }
 0x2c4   : > { %1459 = vmatprep.subr.bf16.mxu1 %v1278_v12  ;;  %v1316_v13 = vpop.permute.xlu0 %1315 }
 0x2c5   : > { %v1320_v15 = vsel %vm380_vm0, %v1314_v7, %v1316_v13 }
 0x2c6   : > { %1484 = vmatprep.subr.bf16.mxu0 %v1320_v15 }
 0x2c7   : > { %v1270_v16 = vpop.permute.xlu1 %1269 }
 0x2c8   : > { %v1312_v20 = vpop.permute.xlu0 %1311  ;;  %v1277_v23 = vsel %vm715_vm7, %v1270_v16, %v1272_v0 }
 0x2c9   : > { %v1319_v57 = vsel %vm380_vm0, %v1312_v20, %v1314_v7  ;;  %1460 = vmatpush1.bf16.msra.mxu1 %v1277_v23 }
 0x2ca   : > { %1485 = vmatpush1.bf16.msra.mxu0 %v1319_v57 }
 0x2cc   : > { %1462 = vmatmul.mubr.bf16.vlgmr.msra.gmra.mrb[0].mxu1 %v1753_v24 }
 0x2cd   : > { %1515 = vmatmul.mubr.bf16.vlgmr.msra.gmra.mrb[8].mxu0 %v1756_v56  ;;  %1471 = vmatprep.mubr.bf16.mxu1 %v1757_v25 }
 0x2ce   : > { %1524 = vmatprep.mubr.bf16.mxu0 %v1770_v19 }
 0x2d4   : > { %1472 = vmatmul.mubr.bf16.gmra.mrb[4].mxu1 %v1759_v28 }
 0x2d5   : > { %1525 = vmatmul.mubr.bf16.gmra.mrb[12].mxu0 %v1760_v29 }
 0x2d8   : > { %v1542_v31 = vpop.permute.xlu1 %1541 }
 0x2d9   : > { %v1547_v32 = vpop.permute.xlu0 %1546 }
 0x2dc   : > { %v1552_v33 = vpop.permute.xlu1 %1551 }
 0x2dd   : > { %v1557_v34 = vpop.permute.xlu0 %1556 }
 0x2e0   : > { %v1574_v9 = vpop.permute.xlu1 %1573 }
 0x2e1   : > { %v1579_v3 = vpop.permute.xlu0 %1578 }
 0x2e4   : > { %v1584_v53 = vpop.permute.xlu1 %1583 }
 0x2e5   : > { %v1589_v60 = vpop.permute.xlu0 %1588 }
 0x39f   : > { %v1463_v36 = vpop.f32.mrb[0].mxu1 }
 0x3a0   : > { %v1516_v38 = vpop.f32.mrb[8].mxu0  ;;  %v1465_v39 = vpop.f32.mrb[1].mxu1 }
 0x3a1   : > { %v1517_v40 = vadd.f32 %v1516_v38, %v1463_v36  ;;  %v1518_v19 = vpop.f32.mrb[9].mxu0  ;;  %v1467_v41 = vpop.f32.mrb[2].mxu1 }
 0x3a2   : > { %v1519_v42 = vadd.f32 %v1518_v19, %v1465_v39  ;;  %v1520_v1 = vpop.f32.mrb[10].mxu0  ;;  %v1469_v8 = vpop.f32.mrb[3].mxu1 }
 0x3a3   : > { %v1559_v63 = vmul.f32 %v1542_v31, %v1517_v40  ;;  %v1521_v43 = vadd.f32 %v1520_v1, %v1467_v41  ;;  %v1522_v61 = vpop.f32.mrb[11].mxu0 }
 0x3a4   : > { %v1560_v44 = vmul.f32 %v1542_v31, %v1519_v42  ;;  %v1523_v62 = vadd.f32 %v1522_v61, %v1469_v8 }
 0x3a5   : > { %v1591_v6 = vadd.f32 %v1574_v9, %v1559_v63  ;;  %v1561_v11 = vmul.f32 %v1547_v32, %v1521_v43 }
 0x3a6   : > { %v1592_v14 = vadd.f32 %v1574_v9, %v1560_v44  ;;  %v1562_v17 = vmul.f32 %v1547_v32, %v1523_v62 }
 0x3a7   : > { %v1599_v18 = vmax.f32 %v1591_v6, 0.0  ;;  %v1593_v21 = vadd.f32 %v1579_v3, %v1561_v11  ;;  %v1473_v22 = vpop.f32.mrb[4].mxu1 }
 0x3a8   : > { %v1600_v45 = vmax.f32 %v1592_v14, 0.0  ;;  %v1594_v46 = vadd.f32 %v1579_v3, %v1562_v17  ;;  %v1526_v27 = vpop.f32.mrb[12].mxu0  ;;  %v1475_v30 = vpop.f32.mrb[5].mxu1 }
 0x3a9   : > { %1607 = vst [vmem:[%s2248_s12] sm:$0xff] %v1599_v18  ;;  %v1601_v26 = vmax.f32 %v1593_v21, 0.0  ;;  %v1527_v47 = vadd.f32 %v1526_v27, %v1473_v22  ;;  %v1528_v10 = vpop.f32.mrb[13].mxu0  ;;  %v1477_v2 = vpop.f32.mrb[6].mxu1 }
 0x3aa   : > { %1608 = vst [vmem:[%s2248_s12 + $0x8] sm:$0xff] %v1600_v45  ;;  %v1602_v48 = vmax.f32 %v1594_v46, 0.0  ;;  %v1529_v37 = vadd.f32 %v1528_v10, %v1475_v30  ;;  %v1530_v35 = vpop.f32.mrb[14].mxu0  ;;  %v1479_v49 = vpop.f32.mrb[7].mxu1 }
 0x3ab   : > { %1609 = vst [vmem:[%s2248_s12 + $0x10] sm:$0xff] %v1601_v26  ;;  %v1563_v50 = vmul.f32 %v1552_v33, %v1527_v47  ;;  %v1531_v51 = vadd.f32 %v1530_v35, %v1477_v2  ;;  %v1532_v52 = vpop.f32.mrb[15].mxu0 }
 0x3ac   : > { %1610 = vst [vmem:[%s2248_s12 + $0x18] sm:$0xff] %v1602_v48  ;;  %v1564_v54 = vmul.f32 %v1552_v33, %v1529_v37  ;;  %v1533_v55 = vadd.f32 %v1532_v52, %v1479_v49 }
 0x3ad   : > { %v1595_v58 = vadd.f32 %v1584_v53, %v1563_v50  ;;  %v1565_v59 = vmul.f32 %v1557_v34, %v1531_v51 }
 0x3ae   : > { %v1596_v0 = vadd.f32 %v1584_v53, %v1564_v54  ;;  %v1566_v4 = vmul.f32 %v1557_v34, %v1533_v55 }
 0x3af   : > { %v1603_v5 = vmax.f32 %v1595_v58, 0.0  ;;  %v1597_v7 = vadd.f32 %v1589_v60, %v1565_v59 }
 0x3b0   : > { %v1604_v12 = vmax.f32 %v1596_v0, 0.0  ;;  %v1598_v13 = vadd.f32 %v1589_v60, %v1566_v4 }
 0x3b1   : > { %1611 = vst [vmem:[%s2248_s12 + $0x20] sm:$0xff] %v1603_v5  ;;  %v1605_v15 = vmax.f32 %v1597_v7, 0.0 }
 0x3b2   : > { %1612 = vst [vmem:[%s2248_s12 + $0x28] sm:$0xff] %v1604_v12  ;;  %v1606_v16 = vmax.f32 %v1598_v13, 0.0 }
 0x3b3   : > { %1613 = vst [vmem:[%s2248_s12 + $0x30] sm:$0xff] %v1605_v15 }
 0x3b4   : > { %1614 = vst [vmem:[%s2248_s12 + $0x38] sm:$0xff] %v1606_v16 }
 0x3b5 PF: > { %s18_s27 = sadd.s32 1, %s1767_s27  }
 0x3b6   : > { %p15_p4 = scmp.ge.s32.totalorder %s18_s27, 4  }
 0x3b8   :  { %17 = sbr.rel (!%p15_p4) target bundleno = 1 (0x1), region = 87 }

</bundles_post_ra>
